<compile_context>
chip_gen: v7x
topology: tpu7x:2x2x1
jax: 0.10.0
libtpu: 0.0.40
codegen_flags: <defaults>
</compile_context>

<pallas_src>
import functools

import jax
import jax.numpy as jnp
from jax import lax
from jax.experimental import pallas as pl
from jax.experimental.pallas import tpu as pltpu


def _router_kernel(x_ref, w_ref, b_ref,
                   logits_ref, weights_ref, idx_ref, mask_ref,
                   *, top_k: int):
    x = x_ref[...]                                   # (Tt, H)  native dtype
    w = w_ref[...]                                   # (E,  H)  x.dtype
    b = b_ref[...].astype(jnp.float32)               # (E,  1)

    # logits^T = W @ x^T  (contract last dims of both -> MXU trans-b path,
    # f32 accumulation, no materialized transpose).
    logits = lax.dot_general(
        w, x, dimension_numbers=(((1,), (1,)), ((), ())),
        preferred_element_type=jnp.float32) + b      # (E, Tt) f32

    logits_out = logits.astype(logits_ref.dtype)     # nn.Linear output dtype
    logits_ref[...] = logits_out

    # F.softmax(..., dim=1, dtype=float32) + topk: softmax is strictly monotone,
    # so ranking directly on the (dtype-rounded, then f32) logits gives the
    # identical indices the reference module produces.
    lg = logits_out.astype(jnp.float32)              # (E, Tt)
    E, Tt = lg.shape
    row_ids = lax.broadcasted_iota(jnp.int32, (E, Tt), 0)

    work = lg
    top_vals, top_idxs = [], []
    for k in range(top_k):                           # static, tiny K
        v = jnp.max(work, axis=0, keepdims=True)     # (1, Tt) sublane reduce
        is_max = work == v
        idx = jnp.min(jnp.where(is_max, row_ids, E), axis=0,
                      keepdims=True).astype(jnp.int32)   # lowest index on ties
        sel = row_ids == idx                         # (E, Tt) one-hot selection
        top_vals.append(v)
        top_idxs.append(idx)
        work = jnp.where(sel, -jnp.inf, work)

    vals = jnp.concatenate(top_vals, axis=0)         # (K, Tt) top-k logits
    idxs = jnp.concatenate(top_idxs, axis=0)         # (K, Tt) int32

    # expert_mask directly in its final (E, K, Tt) layout, int8, single
    # lane-dense store.  The iota along the leading dim is a per-slab constant
    # and idxs already lives in the (K-sublane, Tt-lane) layout, so this compare
    # needs no relayout.
    e_ids = lax.broadcasted_iota(jnp.int32, (E, top_k, Tt), 0)
    mask_ref[...] = (e_ids == idxs[None, :, :]).astype(jnp.int8)

    # Renormalized top-k softmax weights == softmax(logits)[topk] / sum(topk):
    # exp(v_k - v_0) / sum_k exp(v_k - v_0)   (exp on K rows only, rcp on EUP).
    ev = jnp.exp(vals - top_vals[0])                 # (K, Tt)
    denom = jnp.sum(ev, axis=0, keepdims=True)       # (1, Tt)
    wts = ev * pl.reciprocal(denom, approx=True)

    weights_ref[...] = wts.astype(weights_ref.dtype)
    idx_ref[...] = idxs


def _vmem_capacity_bytes():
    try:
        return int(pltpu.get_tpu_info().vmem_capacity_bytes)
    except Exception:
        return 64 * 1024 * 1024                      # conservative (v7x per-TC)


def _choose_tile_t(T, H, E, top_k, itemsize, vmem_cap):
    # Per-token VMEM footprint of an x tile plus all per-token outputs
    # (everything is double-buffered by the default pipeline).
    per_row = (H * itemsize                          # x
               + E * itemsize                        # logits^T
               + top_k * (itemsize + 4)              # weights^T + idx^T
               + top_k * E)                          # expert_mask (int8)
    if vmem_cap >= (100 << 20):                      # v5e / v6e: 128 MiB VMEM
        budget, row_cap = 56 << 20, 2048
    else:                                            # v7x: 64 MiB per TensorCore
        budget, row_cap = 24 << 20, 1024
    max_rows = max(128, budget // (2 * per_row))
    cap = min(max_rows, row_cap)
    if T < 256 and T <= cap:
        return T                                     # tiny problem: one full block
    # Split into >= 2 lane-aligned tiles so v7x's second TensorCore gets work.
    half = ((pl.cdiv(T, 2) + 127) // 128) * 128
    tile = min(cap, half)
    return max(128, (tile // 128) * 128)


@functools.partial(jax.jit, static_argnums=(3,))
def moe_router(x, gate_w, gate_b, top_k):
    """Returns (router_logits, router_weights, selected_experts_indices, expert_mask).

    expert_mask comes back as int8 in the torch (E, top_k, T) layout.
    """
    T, H = x.shape
    E, H2 = gate_w.shape
    assert H2 == H
    dtype = x.dtype
    itemsize = jnp.dtype(dtype).itemsize

    vmem_cap = _vmem_capacity_bytes()
    tile_t = _choose_tile_t(T, H, E, top_k, itemsize, vmem_cap)
    grid = (pl.cdiv(T, tile_t),)

    w = gate_w.astype(dtype)                         # keep matmul in x's dtype
    b = gate_b.reshape(E, 1).astype(jnp.float32)

    kernel = functools.partial(_router_kernel, top_k=top_k)

    bytes_accessed = ((T * H + E * H) * itemsize
                      + T * (E * itemsize + top_k * (itemsize + 4) + top_k * E))
    cost = pl.CostEstimate(flops=2 * T * H * E,
                           transcendentals=T * (top_k + 1),
                           bytes_accessed=int(bytes_accessed))

    per_tile = tile_t * (H * itemsize + E * itemsize
                         + top_k * (itemsize + 4) + top_k * E)
    resident = 2 * (E * H * itemsize + E * 4)        # double-buffered gate w + b
    vmem_limit = int(2 * per_tile + resident + (4 << 20))
    hi = (96 << 20) if vmem_cap >= (100 << 20) else (48 << 20)
    vmem_limit = min(max(vmem_limit, 32 << 20), hi)

    logits_t, weights_t, idx_t, expert_mask = pl.pallas_call(
        kernel,
        grid=grid,
        out_shape=(
            jax.ShapeDtypeStruct((E, T), dtype),            # router_logits^T
            jax.ShapeDtypeStruct((top_k, T), dtype),         # router_weights^T
            jax.ShapeDtypeStruct((top_k, T), jnp.int32),     # indices^T
            jax.ShapeDtypeStruct((E, top_k, T), jnp.int8),   # expert_mask (final layout)
        ),
        in_specs=[
            pl.BlockSpec((tile_t, H), lambda i: (i, 0)),     # streamed x tile
            pl.BlockSpec((E, H), lambda i: (0, 0)),          # resident weight
            pl.BlockSpec((E, 1), lambda i: (0, 0)),          # resident bias
        ],
        out_specs=(
            pl.BlockSpec((E, tile_t), lambda i: (0, i)),
            pl.BlockSpec((top_k, tile_t), lambda i: (0, i)),
            pl.BlockSpec((top_k, tile_t), lambda i: (0, i)),
            pl.BlockSpec((E, top_k, tile_t), lambda i: (0, 0, i)),
        ),
        compiler_params=pltpu.CompilerParams(
            dimension_semantics=("parallel",),
            vmem_limit_bytes=vmem_limit,
        ),
        cost_estimate=cost,
    )(x, w, b)

    # Tiny layout glue back to the PyTorch shapes for the small per-token outputs
    # (the big mask output is already emitted in its final layout).
    router_logits = jnp.transpose(logits_t)                  # (T, E)
    router_weights = jnp.transpose(weights_t)                # (T, K)
    selected_experts_indices = jnp.transpose(idx_t)          # (T, K)
    return router_logits, router_weights, selected_experts_indices, expert_mask


if __name__ == "__main__":
    # config: hidden_dim=32, expert_num=8, topk=2; num_tokens=8
    hidden_dim, expert_num, top_k, num_tokens = 32, 8, 2, 8

    key = jax.random.PRNGKey(0)
    kx, kw, kb = jax.random.split(key, 3)

    # nn.Linear default init: U(-1/sqrt(fan_in), +1/sqrt(fan_in))
    bound = 1.0 / (hidden_dim ** 0.5)
    gate_w = jax.random.uniform(kw, (expert_num, hidden_dim), jnp.float32,
                                minval=-bound, maxval=bound)
    gate_b = jax.random.uniform(kb, (expert_num,), jnp.float32,
                                minval=-bound, maxval=bound)
    x = jax.random.normal(kx, (num_tokens, hidden_dim), jnp.float32)

    logits, weights, idxs, expert_mask = moe_router(x, gate_w, gate_b, top_k)
    jax.block_until_ready((logits, weights, idxs, expert_mask))

    # lightweight sanity checks against a pure-JAX reference
    ref_logits = x @ gate_w.T + gate_b
    ref_probs = jax.nn.softmax(ref_logits.astype(jnp.float32), axis=1)
    ref_vals, ref_idx = lax.top_k(ref_probs, top_k)
    ref_weights = (ref_vals / ref_vals.sum(-1, keepdims=True)).astype(x.dtype)
    ref_mask = jnp.transpose(jax.nn.one_hot(ref_idx, expert_num, dtype=jnp.int8),
                             (2, 1, 0))

    assert logits.shape == (num_tokens, expert_num)
    assert weights.shape == (num_tokens, top_k)
    assert idxs.shape == (num_tokens, top_k)
    assert expert_mask.shape == (expert_num, top_k, num_tokens)
    assert jnp.allclose(logits, ref_logits, atol=1e-5, rtol=1e-5), "logits mismatch"
    assert jnp.array_equal(idxs, ref_idx.astype(jnp.int32)), "indices mismatch"
    # weights use pl.reciprocal(approx=True) -> allow a slightly looser tolerance
    assert jnp.allclose(weights, ref_weights, atol=2e-3, rtol=2e-3), "weights mismatch"
    assert jnp.array_equal(expert_mask, ref_mask), "expert_mask mismatch"

    print("KERNEL_OK")
</pallas_src>

<mosaic_0001>
module attributes {stable_mosaic.version = 11 : i64} {
  func.func @_router_kernel(%arg0: i32, %arg1: memref<8x32xf32, #tpu.memory_space<vmem>>, %arg2: memref<8x32xf32, #tpu.memory_space<vmem>>, %arg3: memref<8x1xf32, #tpu.memory_space<vmem>>, %arg4: memref<8x8xf32, #tpu.memory_space<vmem>>, %arg5: memref<2x8xf32, #tpu.memory_space<vmem>>, %arg6: memref<2x8xi32, #tpu.memory_space<vmem>>, %arg7: memref<8x2x8xi8, #tpu.memory_space<vmem>>) attributes {dimension_semantics = [#tpu.dimension_semantics<parallel>], iteration_bounds = array<i64: 1>, scalar_prefetch = 0 : i64, scratch_operands = 0 : i64, tpu.core_type = #tpu.core_type<tc>, window_params = [{transform_indices = @transform_0, window_bounds = array<i64: 8, 32>}, {pipeline_mode = #tpu.pipeline_mode<synchronous>, transform_indices = @transform_1, window_bounds = array<i64: 8, 32>}, {pipeline_mode = #tpu.pipeline_mode<synchronous>, transform_indices = @transform_2, window_bounds = array<i64: 8, 1>}, {transform_indices = @transform_3, window_bounds = array<i64: 8, 8>}, {transform_indices = @transform_4, window_bounds = array<i64: 2, 8>}, {transform_indices = @transform_5, window_bounds = array<i64: 2, 8>}, {transform_indices = @transform_6, window_bounds = array<i64: 8, 2, 8>}]} {
    %c0 = arith.constant 0 : index
    %c0_0 = arith.constant 0 : index
    %0 = vector.load %arg1[%c0, %c0_0] : memref<8x32xf32, #tpu.memory_space<vmem>>, vector<8x32xf32>
    %c0_1 = arith.constant 0 : index
    %c0_2 = arith.constant 0 : index
    %1 = vector.load %arg2[%c0_1, %c0_2] : memref<8x32xf32, #tpu.memory_space<vmem>>, vector<8x32xf32>
    %c0_3 = arith.constant 0 : index
    %c0_4 = arith.constant 0 : index
    %2 = vector.load %arg3[%c0_3, %c0_4] : memref<8x1xf32, #tpu.memory_space<vmem>>, vector<8x1xf32>
    %cst = arith.constant dense<0.000000e+00> : vector<8x8xf32>
    %3 = tpu.matmul %1, %0, %cst {dimension_numbers = #tpu.dot_dimension_numbers<[1], [1], [0], [0], [0, 0, 1, 0], [], []>} : vector<8x32xf32>, vector<8x32xf32>, vector<8x8xf32> -> vector<8x8xf32>
    %4 = vector.broadcast %2 : vector<8x1xf32> to vector<8x8xf32>
    %5 = arith.addf %3, %4 : vector<8x8xf32>
    %c0_5 = arith.constant 0 : index
    %c0_6 = arith.constant 0 : index
    %6 = vector.load %arg4[%c0_5, %c0_6] : memref<8x8xf32, #tpu.memory_space<vmem>>, vector<8x8xf32>
    tpu.vector_store %arg4[%c0_5, %c0_6], %5 {strides = array<i32>} : memref<8x8xf32, #tpu.memory_space<vmem>>, vector<8x8xf32>,
    %7 = tpu.iota {dimensions = array<i32: 0>} : vector<8x8xi32>
    %cst_7 = arith.constant dense<0xFF800000> : vector<8xf32>
    %8 = vector.multi_reduction <maximumf>, %5, %cst_7 [0] : vector<8x8xf32> to vector<8xf32>
    %9 = vector.shape_cast %8 : vector<8xf32> to vector<1x8xf32>
    %10 = vector.broadcast %9 : vector<1x8xf32> to vector<8x8xf32>
    %11 = arith.cmpf oeq, %5, %10 : vector<8x8xf32>
    %c8_i32 = arith.constant 8 : i32
    %12 = vector.broadcast %c8_i32 : i32 to vector<8x8xi32>
    %13 = arith.select %11, %7, %12 : vector<8x8xi1>, vector<8x8xi32>
    %cst_8 = arith.constant dense<2147483647> : vector<8xi32>
    %14 = vector.multi_reduction <minsi>, %13, %cst_8 [0] : vector<8x8xi32> to vector<8xi32>
    %15 = vector.shape_cast %14 : vector<8xi32> to vector<1x8xi32>
    %16 = vector.broadcast %15 : vector<1x8xi32> to vector<8x8xi32>
    %17 = arith.cmpi eq, %7, %16 : vector<8x8xi32>
    %cst_9 = arith.constant 0xFF800000 : f32
    %18 = vector.broadcast %cst_9 : f32 to vector<8x8xf32>
    %19 = arith.select %17, %18, %5 : vector<8x8xi1>, vector<8x8xf32>
    %cst_10 = arith.constant dense<0xFF800000> : vector<8xf32>
    %20 = vector.multi_reduction <maximumf>, %19, %cst_10 [0] : vector<8x8xf32> to vector<8xf32>
    %21 = vector.shape_cast %20 : vector<8xf32> to vector<1x8xf32>
    %22 = vector.broadcast %21 : vector<1x8xf32> to vector<8x8xf32>
    %23 = arith.cmpf oeq, %19, %22 : vector<8x8xf32>
    %c8_i32_11 = arith.constant 8 : i32
    %24 = vector.broadcast %c8_i32_11 : i32 to vector<8x8xi32>
    %25 = arith.select %23, %7, %24 : vector<8x8xi1>, vector<8x8xi32>
    %cst_12 = arith.constant dense<2147483647> : vector<8xi32>
    %26 = vector.multi_reduction <minsi>, %25, %cst_12 [0] : vector<8x8xi32> to vector<8xi32>
    %27 = vector.shape_cast %26 : vector<8xi32> to vector<1x8xi32>
    %28 = tpu.concatenate %9, %21 in 0 : vector<1x8xf32>, vector<1x8xf32> -> vector<2x8xf32>
    %29 = tpu.concatenate %15, %27 in 0 : vector<1x8xi32>, vector<1x8xi32> -> vector<2x8xi32>
    %30 = tpu.iota {dimensions = array<i32: 0>} : vector<8x2x8xi32>
    %31 = vector.shape_cast %29 : vector<2x8xi32> to vector<1x2x8xi32>
    %32 = vector.broadcast %31 : vector<1x2x8xi32> to vector<8x2x8xi32>
    %33 = arith.cmpi eq, %30, %32 : vector<8x2x8xi32>
    %34 = arith.extui %33 : vector<8x2x8xi1> to vector<8x2x8xi8>
    %c0_13 = arith.constant 0 : index
    %c0_14 = arith.constant 0 : index
    %c0_15 = arith.constant 0 : index
    %35 = vector.load %arg7[%c0_13, %c0_14, %c0_15] : memref<8x2x8xi8, #tpu.memory_space<vmem>>, vector<8x2x8xi8>
    tpu.vector_store %arg7[%c0_13, %c0_14, %c0_15], %34 {strides = array<i32>} : memref<8x2x8xi8, #tpu.memory_space<vmem>>, vector<8x2x8xi8>,
    %36 = vector.broadcast %9 : vector<1x8xf32> to vector<2x8xf32>
    %37 = arith.subf %28, %36 : vector<2x8xf32>
    %38 = math.exp %37 : vector<2x8xf32>
    %cst_16 = arith.constant dense<0.000000e+00> : vector<8xf32>
    %39 = vector.multi_reduction <add>, %38, %cst_16 [0] : vector<2x8xf32> to vector<8xf32>
    %40 = vector.shape_cast %39 : vector<8xf32> to vector<1x8xf32>
    %41 = tpu.reciprocal %40 {approx = true} : vector<1x8xf32> -> vector<1x8xf32>
    %42 = vector.broadcast %41 : vector<1x8xf32> to vector<2x8xf32>
    %43 = arith.mulf %38, %42 : vector<2x8xf32>
    %c0_17 = arith.constant 0 : index
    %c0_18 = arith.constant 0 : index
    %44 = vector.load %arg5[%c0_17, %c0_18] : memref<2x8xf32, #tpu.memory_space<vmem>>, vector<2x8xf32>
    tpu.vector_store %arg5[%c0_17, %c0_18], %43 {strides = array<i32>} : memref<2x8xf32, #tpu.memory_space<vmem>>, vector<2x8xf32>,
    %c0_19 = arith.constant 0 : index
    %c0_20 = arith.constant 0 : index
    %45 = vector.load %arg6[%c0_19, %c0_20] : memref<2x8xi32, #tpu.memory_space<vmem>>, vector<2x8xi32>
    tpu.vector_store %arg6[%c0_19, %c0_20], %29 {strides = array<i32>} : memref<2x8xi32, #tpu.memory_space<vmem>>, vector<2x8xi32>,
    return
  }
  func.func @transform_0(%arg0: i32) -> (i32, i32) {
    %c0_i32 = arith.constant 0 : i32
    %c0_i32_0 = arith.constant 0 : i32
    return %arg0, %c0_i32 : i32, i32
  }
  func.func @transform_1(%arg0: i32) -> (i32, i32) {
    %c0_i32 = arith.constant 0 : i32
    %c0_i32_0 = arith.constant 0 : i32
    %c0_i32_1 = arith.constant 0 : i32
    return %c0_i32, %c0_i32_0 : i32, i32
  }
  func.func @transform_2(%arg0: i32) -> (i32, i32) {
    %c0_i32 = arith.constant 0 : i32
    %c0_i32_0 = arith.constant 0 : i32
    %c0_i32_1 = arith.constant 0 : i32
    return %c0_i32, %c0_i32_0 : i32, i32
  }
  func.func @transform_3(%arg0: i32) -> (i32, i32) {
    %c0_i32 = arith.constant 0 : i32
    %c0_i32_0 = arith.constant 0 : i32
    return %c0_i32, %arg0 : i32, i32
  }
  func.func @transform_4(%arg0: i32) -> (i32, i32) {
    %c0_i32 = arith.constant 0 : i32
    %c0_i32_0 = arith.constant 0 : i32
    return %c0_i32, %arg0 : i32, i32
  }
  func.func @transform_5(%arg0: i32) -> (i32, i32) {
    %c0_i32 = arith.constant 0 : i32
    %c0_i32_0 = arith.constant 0 : i32
    return %c0_i32, %arg0 : i32, i32
  }
  func.func @transform_6(%arg0: i32) -> (i32, i32, i32) {
    %c0_i32 = arith.constant 0 : i32
    %c0_i32_0 = arith.constant 0 : i32
    %c0_i32_1 = arith.constant 0 : i32
    return %c0_i32, %c0_i32_0, %arg0 : i32, i32, i32
  }
}

</mosaic_0001>

<bundles_post_ra>
// kernel: moe_router.1
= control target key start
LH: loop header
LB: loop body
LE: loop exit
PB: predicated region body
PF: predicated region fallthrough
CT: control target
= control target key end

     0   :  { %12 = vsyncpa [#allocation3], 0  ;;  %vm30_vm0 = vcmask 261120   ;;  %v331_v1 = vmov 0.0   ;;  %vm332_vm1 = vmmov 0   ;;  %s519_s0 = inlined_call_operand.vmem [shape: f32[8,32], index: 0, kind: input, shape index: {}]   ;;  %s520_s1 = inlined_call_operand.vmem [shape: f32[8,32], index: 1, kind: input, shape index: {}]   ;;  %s521_s2 = inlined_call_operand.vmem [shape: f32[8,1], index: 2, kind: input, shape index: {}]   ;;  %s522_s3 = inlined_call_operand.vmem [shape: f32[8,8], index: 3, kind: output, shape index: {0}]   ;;  %s523_s4 = inlined_call_operand.hbm [shape: f32[2,8], index: 4, kind: output, shape index: {1}]   ;;  %s524_s5 = inlined_call_operand.hbm [shape: s32[2,8], index: 5, kind: output, shape index: {2}]   ;;  %s525_s6 = inlined_call_operand.vmem [shape: s8[8,2,8], index: 6, kind: output, shape index: {3}]  }
   0x1   :  { %v22_v0 = vld [vmem:[%s519_s0] sm:$0xff]  ;;  %268 = vmatprep.subr.mxu0 %v331_v1  ;;  %270 = vmatprep.mubr.msk.f32.mxu0 %vm332_vm1, %v331_v1 }
   0x2   :  { %v24_v2 = vld [vmem:[%s521_s2] sm:$0xff] }
   0x3   :  { %13 = vsyncpa [#allocation5], 0  ;;  %269 = vmatpush3.xpose.msk.msra.mxu0 %vm30_vm0, %v22_v0  ;;  %v23_v3 = vld [vmem:[%s520_s1] sm:$0xff]  ;;  %v333_v4 = vmov 0   ;;  %vm107_vm2 = vcmask 64512   ;;  %v109_v13 = vlaneseq  ;;  %vm151_vm8 = vcmask 1040384  }
   0x4   :  { %278 = vset.pattern.permute.xlu0 %v333_v4  ;;  %s334_s1 = smov [#allocation4]   ;;  %vm186_vm13 = vcmask 57344   ;;  %vm187_vm14 = vsmask.f32 256  ;;  %vm216_vm15 = vcmask 58368  }
   0x5   :  { %27 = vperm.xlu0 %278, %v24_v2   ;;  %v110_v16 = vshrl.u32 %v109_v13, 7  ;;  %s246_s2 = sshll.u32 %s334_s1, 4  ;;  %v189_v49 = vld [vmem:[%s525_s6] sm:$0x1]  ;;  %s247_s2 = int_to_ptr.vmem [resolvable:$true] %s246_s2 }
   0x6   :  { %271 = vmatmul.mubr.msk.f32.vlgmr.msra.gmra.mrb[0].mxu0 %vm30_vm0, %v23_v3  ;;  %s283_s29 = scalar_lea.vmem %s247_s2, 32  ;;  %p288_p1 = scmp.lt.s32.totalorder %s247_s2, %s247_s2 }
   0x7   :  { %p284_p0 = scmp.ne.s32.totalorder %s247_s2, %s283_s29  ;;  %p289_p2 = scmp.lt.s32.totalorder %s283_s29, %s283_s29 }
   0x9   :  { %p290_p3 = por %p289_p2, %p288_p1 }
   0xb   :  { %p291_p4 = pnand %p290_p3, %p284_p0 }
  0x84   :  { %v28_v5 = vpop.permute.xlu0 %27 }
  0xd9   :  { %v103_v6 = vpop.f32.mrb[0].mxu0 }
  0xda   :  { %v104_v7 = vadd.f32 %v103_v6, %v28_v5  ;;  %v272_v8 = vpop.f32.mrb[1].mxu0 }
  0xdc   :  { %108 = vst.msk [vmem:[%s522_s3] sm:$0xff] %vm107_vm2, %v104_v7  ;;  %v111_v9 = vsel %vm107_vm2, %v104_v7, -inf }
  0xdd   :  { %v112_v10 = vrot.slane %v111_v9, 4 }
  0xdf   :  { %v113_v11 = vmax.f32 %v111_v9, %v112_v10 }
  0xe1   :  { %v114_v12 = vrot.slane %v113_v11, 2 }
  0xe3   :  { %v115_v14 = vmax.f32 %v113_v11, %v114_v12 }
  0xe5   :  { %v116_v15 = vrot.slane %v115_v14, 1 }
  0xe7   :  { %v117_v17 = vmax.f32 %v115_v14, %v116_v15 }
  0xe9   :  { %vm118_vm3 = vcmp.eq.f32.partialorder %v104_v7, %v117_v17 }
  0xea   :  { %v119_v18 = vsel %vm118_vm3, %v110_v16, 8 }
  0xeb   :  { %v120_v19 = vsel %vm107_vm2, %v119_v18, 2147483647 }
  0xec   :  { %v121_v20 = vrot.slane %v120_v19, 4 }
  0xee   :  { %vm122_vm4 = vcmp.lt.s32.totalorder %v120_v19, %v121_v20 }
  0xef   :  { %v123_v21 = vsel %vm122_vm4, %v120_v19, %v121_v20 }
  0xf0   :  { %v124_v22 = vrot.slane %v123_v21, 2 }
  0xf2   :  { %vm125_vm5 = vcmp.lt.s32.totalorder %v123_v21, %v124_v22 }
  0xf3   :  { %v126_v23 = vsel %vm125_vm5, %v123_v21, %v124_v22 }
  0xf4   :  { %v127_v24 = vrot.slane %v126_v23, 1 }
  0xf6   :  { %vm128_vm6 = vcmp.lt.s32.totalorder %v126_v23, %v127_v24 }
  0xf7   :  { %v129_v25 = vsel %vm128_vm6, %v126_v23, %v127_v24 }
  0xf8   :  { %vm130_vm7 = vcmp.eq.s32.totalorder %v110_v16, %v129_v25 }
  0xf9   :  { %v131_v26 = vsel %vm130_vm7, -inf, %v104_v7 }
  0xfa   :  { %v132_v27 = vsel %vm107_vm2, %v131_v26, -inf }
  0xfb   :  { %v133_v28 = vrot.slane %v132_v27, 4 }
  0xfd   :  { %v134_v29 = vmax.f32 %v132_v27, %v133_v28 }
  0xff   :  { %v135_v30 = vrot.slane %v134_v29, 2 }
 0x101   :  { %v136_v31 = vmax.f32 %v134_v29, %v135_v30 }
 0x103   :  { %v137_v32 = vrot.slane %v136_v31, 1 }
 0x105   :  { %v138_v33 = vmax.f32 %v136_v31, %v137_v32 }
 0x107   :  { %vm139_vm9 = vcmp.eq.f32.partialorder %v131_v26, %v138_v33  ;;  %v152_v34 = vsel %vm151_vm8, %v117_v17, %v138_v33 }
 0x108   :  { %v140_v35 = vsel %vm139_vm9, %v110_v16, 8  ;;  %v213_v36 = vsub.f32 %v152_v34, %v117_v17 }
 0x109   :  { %v141_v37 = vsel %vm107_vm2, %v140_v35, 2147483647  ;;  %vm397_vm2 = vmand %vm186_vm13, %vm187_vm14 }
 0x10a   :  { %v142_v38 = vrot.slane %v141_v37, 4  ;;  %v214_v39 = vmul.f32 1.442695, %v213_v36 }
 0x10c   :  { %vm143_vm10 = vcmp.lt.s32.totalorder %v141_v37, %v142_v38  ;;  %279 = vpow2.f32 %v214_v39 }
 0x10d   :  { %v144_v40 = vsel %vm143_vm10, %v141_v37, %v142_v38 }
 0x10e   :  { %v145_v41 = vrot.slane %v144_v40, 2 }
 0x110   :  { %vm146_vm11 = vcmp.lt.s32.totalorder %v144_v40, %v145_v41 }
 0x111   :  { %v147_v42 = vsel %vm146_vm11, %v144_v40, %v145_v41 }
 0x112   :  { %v148_v43 = vrot.slane %v147_v42, 1 }
 0x114   :  { %vm149_vm12 = vcmp.lt.s32.totalorder %v147_v42, %v148_v43 }
 0x115   :  { %v150_v44 = vsel %vm149_vm12, %v147_v42, %v148_v43 }
 0x116   :  { %v390_v45 = vpop.eup %279  ;;  %v393_v46 = vsel %vm151_vm8, %v129_v25, %v150_v44 }
 0x117   :  { %vm154_vm0 = vcmp.eq.s32.totalorder %v393_v46, 0  ;;  %vm155_vm1 = vcmp.eq.s32.totalorder %v393_v46, 1  ;;  %227 = vst.msk [vmem:[#allocation4] sm:$0x3] %vm216_vm15, %v393_v46 }
 0x118   :  { %vm403_vm3 = vmpackc.low %vm154_vm0, %vm154_vm0 }
 0x119   :  { %294 = shalt.err (!%p291_p4)
}
 0x11a   :  { %s295_s8 = scalar_lea.hbm %s524_s5, 32 }
 0x11b   :  { %p296_p5 = scmp.ne.s32.totalorder %s524_s5, %s295_s8  ;;  %p299_p6 = scmp.lt.u32.totalorder %s295_s8, %s524_s5 }
 0x11d   :  { %p301_p7 = pnand %p299_p6, %p296_p5 }
 0x11f   :  { %304 = shalt.err (!%p301_p7)
}
 0x120   :  { %249 = dma.vmem_to_hbm [thread:$0]  %s247_s2, 32, %s524_s5, [#allocation5]   ;;  %vm156_vm4 = vcmp.eq.s32.totalorder %v393_v46, 2  ;;  %vm163_vm5 = vmpackc.even %vm403_vm3, %vm403_vm3  ;;  %v217_v50 = vsel %vm216_vm15, %v390_v45, 0.0  ;;  %v192_v52 = vld [vmem:[%s525_s6 + $0x1] sm:$0x1] }
 0x121   :  { %vm164_vm6 = vmpackc.low %vm155_vm1, %vm155_vm1  ;;  %v178_v51 = vsel %vm163_vm5, 16843009, %v333_v4  ;;  %v218_v53 = vrot.slane %v217_v50, 4  ;;  %vm157_vm7 = vcmp.eq.s32.totalorder %v393_v46, 3  ;;  %v195_v56 = vld [vmem:[%s525_s6 + $0x2] sm:$0x1] }
 0x122   :  { %vm165_vm8 = vmpackc.even %vm164_vm6, %vm164_vm6  ;;  %v190_v54 = vsel %vm397_vm2, %v178_v51, %v189_v49  ;;  %vm158_vm10 = vcmp.eq.s32.totalorder %v393_v46, 4  ;;  %v198_v60 = vld [vmem:[%s525_s6 + $0x3] sm:$0x1]  ;;  %vm159_vm13 = vcmp.eq.s32.totalorder %v393_v46, 5  ;;  %v201_v0 = vld [vmem:[%s525_s6 + $0x4] sm:$0x1] }
 0x123   :  { %vm166_vm9 = vmpackc.low %vm156_vm4, %vm156_vm4  ;;  %v179_v55 = vsel %vm165_vm8, 16843009, %v333_v4  ;;  %191 = vst [vmem:[%s525_s6] sm:$0x1] %v190_v54  ;;  %v219_v57 = vadd.f32 %v218_v53, %v217_v50  ;;  %vm160_vm1 = vcmp.eq.s32.totalorder %v393_v46, 6  ;;  %v204_v5 = vld [vmem:[%s525_s6 + $0x5] sm:$0x1] }
 0x124   :  { %vm167_vm11 = vmpackc.even %vm166_vm9, %vm166_vm9  ;;  %v193_v58 = vsel %vm397_vm2, %v179_v55, %v192_v52  ;;  %vm161_vm5 = vcmp.eq.s32.totalorder %v393_v46, 7  ;;  %v207_v9 = vld [vmem:[%s525_s6 + $0x6] sm:$0x1]  ;;  %v210_v13 = vld [vmem:[%s525_s6 + $0x7] sm:$0x1]  ;;  %s335_s16 = smov [#allocation2]  }
 0x125   :  { %vm168_vm12 = vmpackc.low %vm157_vm7, %vm157_vm7  ;;  %v180_v59 = vsel %vm167_vm11, 16843009, %v333_v4  ;;  %194 = vst [vmem:[%s525_s6 + $0x1] sm:$0x1] %v193_v58  ;;  %v220_v61 = vrot.slane %v219_v57, 2  ;;  %s236_s5 = sshll.u32 %s335_s16, 4  ;;  %s237_s5 = int_to_ptr.vmem [resolvable:$true] %s236_s5 }
 0x126   :  { %vm169_vm14 = vmpackc.even %vm168_vm12, %vm168_vm12  ;;  %v196_v62 = vsel %vm397_vm2, %v180_v59, %v195_v56  ;;  %s305_s17 = scalar_lea.vmem %s237_s5, 32  ;;  %p310_p9 = scmp.lt.s32.totalorder %s237_s5, %s237_s5 }
 0x127   :  { %vm170_vm0 = vmpackc.low %vm158_vm10, %vm158_vm10  ;;  %v181_v63 = vsel %vm169_vm14, 16843009, %v333_v4  ;;  %197 = vst [vmem:[%s525_s6 + $0x2] sm:$0x1] %v196_v62  ;;  %v221_v1 = vadd.f32 %v220_v61, %v219_v57  ;;  %p306_p8 = scmp.ne.s32.totalorder %s237_s5, %s305_s17  ;;  %p311_p10 = scmp.lt.s32.totalorder %s305_s17, %s305_s17 }
 0x128   :  { %vm171_vm3 = vmpackc.even %vm170_vm0, %vm170_vm0  ;;  %v199_v2 = vsel %vm397_vm2, %v181_v63, %v198_v60 }
 0x129   :  { %vm172_vm4 = vmpackc.low %vm159_vm13, %vm159_vm13  ;;  %v182_v3 = vsel %vm171_vm3, 16843009, %v333_v4  ;;  %200 = vst [vmem:[%s525_s6 + $0x3] sm:$0x1] %v199_v2  ;;  %v222_v6 = vrot.slane %v221_v1, 1  ;;  %p312_p11 = por %p311_p10, %p310_p9 }
 0x12a   :  { %vm173_vm6 = vmpackc.even %vm172_vm4, %vm172_vm4  ;;  %v202_v7 = vsel %vm397_vm2, %v182_v3, %v201_v0 }
 0x12b   :  { %vm174_vm7 = vmpackc.low %vm160_vm1, %vm160_vm1  ;;  %v183_v8 = vsel %vm173_vm6, 16843009, %v333_v4  ;;  %203 = vst [vmem:[%s525_s6 + $0x4] sm:$0x1] %v202_v7  ;;  %v223_v10 = vadd.f32 %v222_v6, %v221_v1  ;;  %p313_p12 = pnand %p312_p11, %p306_p8 }
 0x12c   :  { %vm175_vm8 = vmpackc.even %vm174_vm7, %vm174_vm7  ;;  %v205_v11 = vsel %vm397_vm2, %v183_v8, %v204_v5 }
 0x12d   :  { %vm176_vm9 = vmpackc.low %vm161_vm5, %vm161_vm5  ;;  %v184_v12 = vsel %vm175_vm8, 16843009, %v333_v4  ;;  %206 = vst [vmem:[%s525_s6 + $0x5] sm:$0x1] %v205_v11  ;;  %281 = vrcp.f32 %v223_v10 }
 0x12e   :  { %vm177_vm10 = vmpackc.even %vm176_vm9, %vm176_vm9  ;;  %v208_v14 = vsel %vm397_vm2, %v184_v12, %v207_v9 }
 0x12f   :  { %v185_v15 = vsel %vm177_vm10, 16843009, %v333_v4  ;;  %209 = vst [vmem:[%s525_s6 + $0x6] sm:$0x1] %v208_v14 }
 0x130   :  { %v211_v16 = vsel %vm397_vm2, %v185_v15, %v210_v13 }
 0x131   :  { %212 = vst [vmem:[%s525_s6 + $0x7] sm:$0x1] %v211_v16 }
 0x137   :  { %v282_v17 = vpop.eup %281 }
 0x138   :  { %v225_v18 = vmul.f32 %v282_v17, %v390_v45 }
 0x13a   :  { %226 = vst.msk [vmem:[#allocation2] sm:$0x3] %vm216_vm15, %v225_v18 }
 0x13b   :  { %316 = shalt.err (!%p313_p12)
}
 0x13c   :  { %s317_s20 = scalar_lea.hbm %s523_s4, 32 }
 0x13d   :  { %p318_p13 = scmp.ne.s32.totalorder %s523_s4, %s317_s20  ;;  %p321_p0 = scmp.lt.u32.totalorder %s317_s20, %s523_s4 }
 0x13f   :  { %p323_p1 = pnand %p321_p0, %p318_p13 }
 0x141   :  { %326 = shalt.err (!%p323_p1)
}
 0x142   :  { %239 = dma.vmem_to_hbm [thread:$0]  %s237_s5, 32, %s523_s4, [#allocation3]  }
 0x143   :  { %327 = dma.done.wait [#allocation3], 32  }
 0x144   :  { %328 = vsyncadd [#allocation3], 4294967264 }
 0x145   :  { %329 = dma.done.wait [#allocation5], 32  }
 0x146   :  { %330 = vsyncadd [#allocation5], 4294967264 }
 0x147   :  { %262 = vsyncpa [#allocation3], 1 }
 0x148   :  { %263 = vsyncpa [#allocation5], 1 }

</bundles_post_ra>
